<compile_context>
chip_gen: v5e
topology: v5e:2x2
jax: 0.10.0
libtpu: 0.0.40
codegen_flags: <defaults>
</compile_context>

<pallas_src>
import jax
import jax.numpy as jnp
from jax import lax
from jax.experimental import pallas as pl
from jax.experimental.pallas import tpu as pltpu


def mlp_kernel(p_ref, s_ref, x_ref, o_ref):
    # p_ref: SMEM (3,)   f32 = [b1, w2_00, b2]
    # s_ref: VMEM (128, 64) f32 selection-weight matrix (resident across steps)
    # x_ref: VMEM (TR, 128)  : 64 interleaved (f0, f1) batch pairs per row
    # o_ref: VMEM (TR, 64)   : one output per pair
    b1 = p_ref[0]
    w2 = p_ref[1]
    b2 = p_ref[2]

    x = x_ref[...].astype(jnp.float32)
    # linear1: weight mul + pairwise (f0,f1) reduce + de-interleave in one MXU op.
    h = jnp.dot(x, s_ref[...],
                preferred_element_type=jnp.float32,
                precision=lax.Precision.HIGHEST)            # (TR, 64)
    h = jnp.maximum(h + b1, 0.0)                             # ReLU(linear1)
    y = jnp.maximum(h * w2 + b2, 0.0)                        # ReLU(linear2), VPU
    o_ref[...] = y.astype(o_ref.dtype)


@jax.jit
def mlp_forward(x, w1, b1, w2, b2):
    """x: [B, 2] (PyTorch convention). Returns [B, 1]."""
    B, F = x.shape
    assert F == 2
    out_dtype = x.dtype

    # Align B to 64 so the flat (f0,f1,...) stream fills whole 128-lane rows.
    # Only copies x when B is misaligned; aligned B => zero extra HBM passes.
    if B % 64 != 0:
        pad = 64 - B % 64
        x = jnp.concatenate([x, jnp.zeros((pad, 2), x.dtype)], axis=0)
    Bp = x.shape[0]
    R = (2 * Bp) // 128                  # rows of the lane-dense view

    x2d = x.reshape(R, 128)              # contiguous reshape: no data movement

    # Selection-weight matrix: out[:, k] = w11 * in[:, 2k] + w12 * in[:, 2k+1]
    rows = jnp.arange(128, dtype=jnp.int32)[:, None]
    cols = jnp.arange(64, dtype=jnp.int32)[None, :]
    w11 = w1.reshape(-1)[0].astype(jnp.float32)
    w12 = w1.reshape(-1)[1].astype(jnp.float32)
    S = (jnp.where(rows == 2 * cols, w11, 0.0)
         + jnp.where(rows == 2 * cols + 1, w12, 0.0)).astype(jnp.float32)

    # Remaining scalars for SMEM: [b1, w2_00, b2]
    params = jnp.concatenate(
        [b1.reshape(-1), w2.reshape(-1), b2.reshape(-1)]).astype(jnp.float32)

    TR = min(2048, R)                    # ~1 MiB f32 input per grid step
    grid = (pl.cdiv(R, TR),)

    out = pl.pallas_call(
        mlp_kernel,
        out_shape=jax.ShapeDtypeStruct((R, 64), out_dtype),
        grid=grid,
        in_specs=[
            pl.BlockSpec(memory_space=pltpu.MemorySpace.SMEM),   # scalars
            pl.BlockSpec((128, 64), lambda i: (0, 0)),           # S (resident)
            pl.BlockSpec((TR, 128), lambda i: (i, 0)),           # x stream
        ],
        out_specs=pl.BlockSpec((TR, 64), lambda i: (i, 0)),
        compiler_params=pltpu.CompilerParams(
            dimension_semantics=("parallel",)),                  # v7x: 2 TCs
    )(params, S, x2d)

    # Row-major flatten of [R, 64] is exactly batch order.
    return out.reshape(Bp)[:B].reshape(B, 1)


def init_params(key):
    # Mimics nn.Linear's uniform(-1/sqrt(fan_in), 1/sqrt(fan_in)) init.
    k1, k2, k3, k4 = jax.random.split(key, 4)
    bound1 = 1.0 / jnp.sqrt(2.0)   # fan_in = 2
    bound2 = 1.0                   # fan_in = 1
    w1 = jax.random.uniform(k1, (1, 2), jnp.float32, -bound1, bound1)
    b1 = jax.random.uniform(k2, (1,), jnp.float32, -bound1, bound1)
    w2 = jax.random.uniform(k3, (1, 1), jnp.float32, -bound2, bound2)
    b2 = jax.random.uniform(k4, (1,), jnp.float32, -bound2, bound2)
    return w1, b1, w2, b2


def _reference(x, w1, b1, w2, b2):
    # Exact element-wise f32 reference (avoids XLA's default-precision dot).
    h = jnp.maximum(x[:, 0:1] * w1[0, 0] + x[:, 1:2] * w1[0, 1] + b1[0], 0.0)
    return jnp.maximum(h * w2[0, 0] + b2[0], 0.0)


if __name__ == "__main__":
    key = jax.random.PRNGKey(0)
    k_x, k_p = jax.random.split(key)
    w1, b1, w2, b2 = init_params(k_p)

    # Small test (B=8, exercises the misaligned-batch pad path).
    B = 8
    x = jax.random.normal(k_x, (B, 2), jnp.float32)
    out = jax.block_until_ready(mlp_forward(x, w1, b1, w2, b2))
    ref = _reference(x, w1, b1, w2, b2)
    assert out.shape == (B, 1)
    assert jnp.allclose(out, ref, atol=1e-5, rtol=1e-5), "mismatch vs reference (B=8)"

    # Slightly larger aligned batch (exercises multi-row lane-dense mapping).
    B2 = 8192
    x2 = jax.random.normal(k_x, (B2, 2), jnp.float32)
    out2 = jax.block_until_ready(mlp_forward(x2, w1, b1, w2, b2))
    ref2 = _reference(x2, w1, b1, w2, b2)
    assert out2.shape == (B2, 1)
    assert jnp.allclose(out2, ref2, atol=1e-5, rtol=1e-5), "mismatch vs reference (B=8192)"

    print("KERNEL_OK")
</pallas_src>

<mosaic_0001>
module attributes {stable_mosaic.version = 11 : i64} {
  func.func @mlp_kernel(%arg0: i32, %arg1: memref<3xf32, #tpu.memory_space<smem>>, %arg2: memref<128x64xf32, #tpu.memory_space<vmem>>, %arg3: memref<1x128xf32, #tpu.memory_space<vmem>>, %arg4: memref<1x64xf32, #tpu.memory_space<vmem>>) attributes {dimension_semantics = [#tpu.dimension_semantics<parallel>], iteration_bounds = array<i64: 1>, scalar_prefetch = 0 : i64, scratch_operands = 0 : i64, tpu.core_type = #tpu.core_type<tc>, window_params = [{transform_indices = @transform_0, window_bounds = array<i64: 3>}, {pipeline_mode = #tpu.pipeline_mode<synchronous>, transform_indices = @transform_1, window_bounds = array<i64: 128, 64>}, {transform_indices = @transform_2, window_bounds = array<i64: 1, 128>}, {transform_indices = @transform_3, window_bounds = array<i64: 1, 64>}]} {
    %c0 = arith.constant 0 : index
    %0 = memref.load %arg1[%c0] : memref<3xf32, #tpu.memory_space<smem>>
    %c1 = arith.constant 1 : index
    %1 = memref.load %arg1[%c1] : memref<3xf32, #tpu.memory_space<smem>>
    %c2 = arith.constant 2 : index
    %2 = memref.load %arg1[%c2] : memref<3xf32, #tpu.memory_space<smem>>
    %c0_0 = arith.constant 0 : index
    %c0_1 = arith.constant 0 : index
    %3 = vector.load %arg3[%c0_0, %c0_1] : memref<1x128xf32, #tpu.memory_space<vmem>>, vector<1x128xf32>
    %c0_2 = arith.constant 0 : index
    %c0_3 = arith.constant 0 : index
    %4 = vector.load %arg2[%c0_2, %c0_3] : memref<128x64xf32, #tpu.memory_space<vmem>>, vector<128x64xf32>
    %cst = arith.constant dense<0.000000e+00> : vector<1x64xf32>
    %5 = tpu.matmul %3, %4, %cst {dimension_numbers = #tpu.dot_dimension_numbers<[1], [0], [0], [1], [0, 0, 1, 1], [], []>, precision = #tpu.contract_precision<fp32>} : vector<1x128xf32>, vector<128x64xf32>, vector<1x64xf32> -> vector<1x64xf32>
    %6 = vector.broadcast %0 : f32 to vector<1x64xf32>
    %7 = arith.addf %5, %6 : vector<1x64xf32>
    %cst_4 = arith.constant 0.000000e+00 : f32
    %8 = vector.broadcast %cst_4 : f32 to vector<1x64xf32>
    %9 = arith.maximumf %7, %8 : vector<1x64xf32>
    %10 = vector.broadcast %1 : f32 to vector<1x64xf32>
    %11 = arith.mulf %9, %10 : vector<1x64xf32>
    %12 = vector.broadcast %2 : f32 to vector<1x64xf32>
    %13 = arith.addf %11, %12 : vector<1x64xf32>
    %cst_5 = arith.constant 0.000000e+00 : f32
    %14 = vector.broadcast %cst_5 : f32 to vector<1x64xf32>
    %15 = arith.maximumf %13, %14 : vector<1x64xf32>
    %c0_6 = arith.constant 0 : index
    %c0_7 = arith.constant 0 : index
    %16 = vector.load %arg4[%c0_6, %c0_7] : memref<1x64xf32, #tpu.memory_space<vmem>>, vector<1x64xf32>
    tpu.vector_store %arg4[%c0_6, %c0_7], %15 {strides = array<i32>} : memref<1x64xf32, #tpu.memory_space<vmem>>, vector<1x64xf32>,
    return
  }
  func.func @transform_0(%arg0: i32) -> i32 {
    %c0_i32 = arith.constant 0 : i32
    %c0_i32_0 = arith.constant 0 : i32
    return %c0_i32 : i32
  }
  func.func @transform_1(%arg0: i32) -> (i32, i32) {
    %c0_i32 = arith.constant 0 : i32
    %c0_i32_0 = arith.constant 0 : i32
    %c0_i32_1 = arith.constant 0 : i32
    return %c0_i32, %c0_i32_0 : i32, i32
  }
  func.func @transform_2(%arg0: i32) -> (i32, i32) {
    %c0_i32 = arith.constant 0 : i32
    %c0_i32_0 = arith.constant 0 : i32
    return %arg0, %c0_i32 : i32, i32
  }
  func.func @transform_3(%arg0: i32) -> (i32, i32) {
    %c0_i32 = arith.constant 0 : i32
    %c0_i32_0 = arith.constant 0 : i32
    return %arg0, %c0_i32 : i32, i32
  }
}

</mosaic_0001>

<bundles_post_ra>
// kernel: mlp_forward.1
= control target key start
LH: loop header
LB: loop body
LE: loop exit
PB: predicated region body
PF: predicated region fallthrough
CT: control target
= control target key end

     0   :  { %8 = vsyncpa [#allocation3], 0  ;;  %s419_s15 = smov [#allocation2]   ;;  %s735_s0 = inlined_call_operand.vmem [shape: f32[3], index: 0, kind: input, shape index: {}]   ;;  %s736_s1 = inlined_call_operand.vmem [shape: f32[128,64], index: 1, kind: input, shape index: {}]   ;;  %s737_s2 = inlined_call_operand.vmem [shape: f32[1,128], index: 2, kind: input, shape index: {}]   ;;  %s738_s3 = inlined_call_operand.vmem [shape: f32[1,64], index: 3, kind: output, shape index: {}]  }
   0x1   :  { %s14_s14 = sshll.u32 %s735_s0, 4  ;;  %s15_s14 = int_to_ptr.vmem [resolvable:$true] %s14_s14 }
   0x2   :  { %17 = dma.vmem_to_smem %s15_s14, 16, %s419_s15, [#allocation3]  }
   0x3   :  { %417 = dma.done.wait [#allocation3], 16  }
   0x4   :  { %418 = vsyncadd [#allocation3], 4294967280 }
   0x5   :  { %26 = sfence }
   0x6   :  { %v46_v0 = vld [vmem:[%s736_s1 + $0x78] sm:$0xff]  ;;  %v45_v1 = vld [vmem:[%s736_s1 + $0x70] sm:$0xff]  ;;  %v44_v2 = vld [vmem:[%s736_s1 + $0x68] sm:$0xff]  ;;  %s402_s21 = sld [smem:[#allocation2 + $0x1]]  ;;  %vm395_vm0 = vcmask 516096  }
   0x7   :  { %v452_v3 = vand.u32 4294901760, %v46_v0  ;;  %v454_v4 = vand.u32 4294901760, %v45_v1  ;;  %v456_v5 = vand.u32 4294901760, %v44_v2  ;;  %v43_v6 = vld [vmem:[%s736_s1 + $0x60] sm:$0xff]  ;;  %v42_v7 = vld [vmem:[%s736_s1 + $0x58] sm:$0xff]  ;;  %v41_v8 = vld [vmem:[%s736_s1 + $0x50] sm:$0xff] }
   0x8   :  { %v467_v9 = vand.u32 4294901760, %v43_v6  ;;  %v469_v10 = vand.u32 4294901760, %v42_v7  ;;  %v471_v11 = vand.u32 4294901760, %v41_v8  ;;  %v40_v12 = vld [vmem:[%s736_s1 + $0x48] sm:$0xff]  ;;  %v39_v13 = vld [vmem:[%s736_s1 + $0x40] sm:$0xff]  ;;  %v38_v21 = vld [vmem:[%s736_s1 + $0x38] sm:$0xff] }
   0x9   :  { %49 = vmatpush.msra.mxu0 %v452_v3  ;;  %v481_v14 = vsub.f32 %v46_v0, %v452_v3  ;;  %v484_v15 = vsub.f32 %v45_v1, %v454_v4  ;;  %v487_v16 = vsub.f32 %v44_v2, %v456_v5  ;;  %v489_v17 = vand.u32 4294901760, %v40_v12  ;;  %245 = vmatpush.msra.mxu3 %v452_v3  ;;  %v37_v34 = vld [vmem:[%s736_s1 + $0x30] sm:$0xff]  ;;  %v36_v35 = vld [vmem:[%s736_s1 + $0x28] sm:$0xff]  ;;  %v35_v42 = vld [vmem:[%s736_s1 + $0x20] sm:$0xff]  ;;  %s403_s0 = sld [smem:[#allocation2 + $0x2]] }
   0xa   :  { %v493_v18 = vsub.f32 %v43_v6, %v467_v9  ;;  %v496_v19 = vsub.f32 %v42_v7, %v469_v10  ;;  %v498_v20 = vand.u32 4294901760, %v39_v13  ;;  %v508_v25 = vsub.f32 %v41_v8, %v471_v11  ;;  %v34_v47 = vld [vmem:[%s736_s1 + $0x18] sm:$0xff]  ;;  %v33_v53 = vld [vmem:[%s736_s1 + $0x10] sm:$0xff]  ;;  %v32_v61 = vld [vmem:[%s736_s1 + $0x8] sm:$0xff] }
   0xb   :  { %51 = vmatpush.msra.mxu0 %v454_v4  ;;  %v91_v22 = vand.u32 4294901760, %v481_v14  ;;  %v97_v23 = vand.u32 4294901760, %v484_v15  ;;  %v103_v24 = vand.u32 4294901760, %v487_v16  ;;  %192 = vmatpush.msra.mxu2 %v481_v14  ;;  %v514_v28 = vsub.f32 %v40_v12, %v489_v17  ;;  %v31_v2 = vld [vmem:[%s736_s1] sm:$0xff] }
   0xc   :  { %v109_v26 = vand.u32 4294901760, %v493_v18  ;;  %v115_v27 = vand.u32 4294901760, %v496_v19  ;;  %247 = vmatpush.msra.mxu3 %v454_v4  ;;  %v527_v32 = vand.u32 4294901760, %v38_v21  ;;  %v531_v33 = vsub.f32 %v39_v13, %v498_v20 }
   0xd   :  { %v92_v29 = vsub.f32 %v481_v14, %v91_v22  ;;  %53 = vmatpush.msra.mxu0 %v456_v5  ;;  %v98_v30 = vsub.f32 %v484_v15, %v97_v23  ;;  %v104_v31 = vsub.f32 %v487_v16, %v103_v24  ;;  %195 = vmatpush.msra.mxu2 %v484_v15  ;;  %v121_v39 = vand.u32 4294901760, %v508_v25 }
   0xe   :  { %249 = vmatpush.msra.mxu3 %v456_v5  ;;  %v110_v38 = vsub.f32 %v493_v18, %v109_v26  ;;  %v116_v40 = vsub.f32 %v496_v19, %v115_v27  ;;  %v127_v41 = vand.u32 4294901760, %v514_v28  ;;  %v555_v44 = vand.u32 4294901760, %v37_v34 }
   0xf   :  { %v93_v36 = vand.u32 4294901760, %v92_v29  ;;  %v99_v37 = vand.u32 4294901760, %v98_v30  ;;  %55 = vmatpush.msra.mxu0 %v467_v9  ;;  %198 = vmatpush.msra.mxu2 %v487_v16  ;;  %v105_v43 = vand.u32 4294901760, %v104_v31  ;;  %v558_v45 = vsub.f32 %v38_v21, %v527_v32  ;;  %v30_v29 = vld [vmem:[%s737_s2] sm:$0x1]  ;;  %s27_s2 = sld [smem:[#allocation2]] }
  0x10   :  { %251 = vmatpush.msra.mxu3 %v467_v9  ;;  %v560_v46 = vand.u32 4294901760, %v36_v35  ;;  %v133_v48 = vand.u32 4294901760, %v531_v33  ;;  %v111_v49 = vand.u32 4294901760, %v110_v38  ;;  %v122_v50 = vsub.f32 %v508_v25, %v121_v39 }
  0x11   :  { %94 = vmatpush.msra.mxu1 %v93_v36  ;;  %57 = vmatpush.msra.mxu0 %v469_v10  ;;  %v573_v51 = vsub.f32 %v37_v34, %v555_v44  ;;  %v575_v52 = vand.u32 4294901760, %v35_v42  ;;  %v580_v54 = vand.u32 4294901760, %v34_v47  ;;  %v117_v55 = vand.u32 4294901760, %v116_v40 }
  0x12   :  { %201 = vmatpush.msra.mxu2 %v493_v18  ;;  %253 = vmatpush.msra.mxu3 %v469_v10  ;;  %v128_v56 = vsub.f32 %v514_v28, %v127_v41  ;;  %v139_v57 = vand.u32 4294901760, %v558_v45  ;;  %v590_v58 = vsub.f32 %v36_v35, %v560_v46  ;;  %v134_v59 = vsub.f32 %v531_v33, %v133_v48 }
  0x13   :  { %100 = vmatpush.msra.mxu1 %v99_v37  ;;  %59 = vmatpush.msra.mxu0 %v471_v11  ;;  %v595_v60 = vand.u32 4294901760, %v33_v53  ;;  %v123_v62 = vand.u32 4294901760, %v122_v50  ;;  %v145_v63 = vand.u32 4294901760, %v573_v51  ;;  %v605_v0 = vsub.f32 %v35_v42, %v575_v52 }
  0x14   :  { %204 = vmatpush.msra.mxu2 %v496_v19  ;;  %255 = vmatpush.msra.mxu3 %v471_v11  ;;  %v608_v1 = vsub.f32 %v34_v47, %v580_v54  ;;  %v129_v6 = vand.u32 4294901760, %v128_v56  ;;  %v140_v7 = vsub.f32 %v558_v45, %v139_v57  ;;  %v151_v8 = vand.u32 4294901760, %v590_v58 }
  0x15   :  { %106 = vmatpush.msra.mxu1 %v105_v43  ;;  %61 = vmatpush.msra.mxu0 %v489_v17  ;;  %v620_v12 = vand.u32 4294901760, %v32_v61  ;;  %v135_v13 = vand.u32 4294901760, %v134_v59  ;;  %v623_v21 = vsub.f32 %v33_v53, %v595_v60  ;;  %v146_v30 = vsub.f32 %v573_v51, %v145_v63 }
  0x16   :  { %207 = vmatpush.msra.mxu2 %v508_v25  ;;  %257 = vmatpush.msra.mxu3 %v489_v17  ;;  %v157_v31 = vand.u32 4294901760, %v605_v0  ;;  %v635_v34 = vand.u32 4294901760, %v31_v2  ;;  %v637_v35 = vand.u32 4294901760, %v30_v29  ;;  %v163_v36 = vand.u32 4294901760, %v608_v1 }
  0x17   :  { %112 = vmatpush.msra.mxu1 %v111_v49  ;;  %63 = vmatpush.msra.mxu0 %v498_v20  ;;  %v141_v37 = vand.u32 4294901760, %v140_v7  ;;  %v152_v38 = vsub.f32 %v590_v58, %v151_v8  ;;  %v647_v40 = vsub.f32 %v32_v61, %v620_v12  ;;  %v147_v43 = vand.u32 4294901760, %v146_v30 }
  0x18   :  { %210 = vmatpush.msra.mxu2 %v514_v28  ;;  %259 = vmatpush.msra.mxu3 %v498_v20  ;;  %v81_v42 = vsub.f32 %v30_v29, %v637_v35  ;;  %v158_v47 = vsub.f32 %v605_v0, %v157_v31  ;;  %v169_v49 = vand.u32 4294901760, %v623_v21  ;;  %v658_v50 = vsub.f32 %v31_v2, %v635_v34 }
  0x19   :  { %118 = vmatpush.msra.mxu1 %v117_v55  ;;  %65 = vmatpush.msra.mxu0 %v527_v32  ;;  %v153_v53 = vand.u32 4294901760, %v152_v38  ;;  %v164_v55 = vsub.f32 %v608_v1, %v163_v36  ;;  %v175_v56 = vand.u32 4294901760, %v647_v40 }
  0x1a   :  { %213 = vmatpush.msra.mxu2 %v531_v33  ;;  %261 = vmatpush.msra.mxu3 %v527_v32  ;;  %v82_v59 = vand.u32 4294901760, %v81_v42  ;;  %v159_v61 = vand.u32 4294901760, %v158_v47  ;;  %v181_v2 = vand.u32 4294901760, %v658_v50 }
  0x1b   :  { %124 = vmatpush.msra.mxu1 %v123_v62  ;;  %67 = vmatpush.msra.mxu0 %v555_v44  ;;  %v170_v62 = vsub.f32 %v623_v21, %v169_v49  ;;  %v176_v7 = vsub.f32 %v647_v40, %v175_v56 }
  0x1c   :  { %216 = vmatpush.msra.mxu2 %v558_v45  ;;  %263 = vmatpush.msra.mxu3 %v555_v44  ;;  %v182_v30 = vsub.f32 %v658_v50, %v181_v2 }
  0x1d   :  { %130 = vmatpush.msra.mxu1 %v129_v6  ;;  %69 = vmatpush.msra.mxu0 %v560_v46  ;;  %v165_v6 = vand.u32 4294901760, %v164_v55  ;;  %v171_v29 = vand.u32 4294901760, %v170_v62 }
  0x1e   :  { %219 = vmatpush.msra.mxu2 %v573_v51  ;;  %265 = vmatpush.msra.mxu3 %v560_v46 }
  0x1f   :  { %136 = vmatpush.msra.mxu1 %v135_v13  ;;  %71 = vmatpush.msra.mxu0 %v575_v52  ;;  %v83_v13 = vsub.f32 %v81_v42, %v82_v59 }
  0x20   :  { %222 = vmatpush.msra.mxu2 %v590_v58  ;;  %267 = vmatpush.msra.mxu3 %v575_v52 }
  0x21   :  { %142 = vmatpush.msra.mxu1 %v141_v37  ;;  %73 = vmatpush.msra.mxu0 %v580_v54  ;;  %v177_v37 = vand.u32 4294901760, %v176_v7  ;;  %v84_v38 = vand.u32 4294901760, %v83_v13 }
  0x22   :  { %225 = vmatpush.msra.mxu2 %v605_v0  ;;  %269 = vmatpush.msra.mxu3 %v580_v54 }
  0x23   :  { %148 = vmatpush.msra.mxu1 %v147_v43  ;;  %75 = vmatpush.msra.mxu0 %v595_v60  ;;  %v183_v43 = vand.u32 4294901760, %v182_v30 }
  0x24   :  { %228 = vmatpush.msra.mxu2 %v608_v1  ;;  %271 = vmatpush.msra.mxu3 %v595_v60 }
  0x25   :  { %154 = vmatpush.msra.mxu1 %v153_v53  ;;  %77 = vmatpush.msra.mxu0 %v620_v12 }
  0x26   :  { %231 = vmatpush.msra.mxu2 %v623_v21  ;;  %273 = vmatpush.msra.mxu3 %v620_v12 }
  0x27   :  { %160 = vmatpush.msra.mxu1 %v159_v61  ;;  %79 = vmatpush.msra.mxu0 %v635_v34 }
  0x28   :  { %234 = vmatpush.msra.mxu2 %v647_v40  ;;  %275 = vmatpush.msra.mxu3 %v635_v34 }
  0x29   :  { %286 = vmatpush.msrb.mxu0 %v91_v22  ;;  %166 = vmatpush.msra.mxu1 %v165_v6  ;;  %v390_v22 = vstv %s402_s21 }
  0x2a   :  { %237 = vmatpush.msra.mxu2 %v658_v50  ;;  %279 = vmatmul.f32.vlgmr.msra.gmra.mxu3 %v82_v59 }
  0x2b   :  { %290 = vmatpush.msrb.mxu0 %v97_v23  ;;  %172 = vmatpush.msra.mxu1 %v171_v29 }
  0x2c   :  { %240 = vmatmul.f32.vlgmr.msra.gmra.mxu2 %v81_v42  ;;  %85 = vmatmul.f32.vlgmr.msra.gmra.mxu0 %v84_v38 }
  0x2d   :  { %294 = vmatpush.msrb.mxu0 %v103_v24  ;;  %178 = vmatpush.msra.mxu1 %v177_v37  ;;  %v392_v24 = vstv %s403_s0 }
  0x2f   :  { %298 = vmatpush.msrb.mxu0 %v109_v26  ;;  %184 = vmatpush.msra.mxu1 %v183_v43 }
  0x30   :  { %186 = vmatmul.f32.vlgmr.msra.gmra.mxu1 %v637_v35 }
  0x31   :  { %353 = vmatpush.msrb.mxu1 %v452_v3  ;;  %302 = vmatpush.msrb.mxu0 %v115_v27  ;;  %v47_v3 = vstv %s27_s2 }
  0x33   :  { %355 = vmatpush.msrb.mxu1 %v454_v4  ;;  %306 = vmatpush.msrb.mxu0 %v121_v39 }
  0x35   :  { %357 = vmatpush.msrb.mxu1 %v456_v5  ;;  %310 = vmatpush.msrb.mxu0 %v127_v41 }
  0x37   :  { %359 = vmatpush.msrb.mxu1 %v467_v9  ;;  %314 = vmatpush.msrb.mxu0 %v133_v48 }
  0x39   :  { %361 = vmatpush.msrb.mxu1 %v469_v10  ;;  %318 = vmatpush.msrb.mxu0 %v139_v57 }
  0x3b   :  { %363 = vmatpush.msrb.mxu1 %v471_v11  ;;  %322 = vmatpush.msrb.mxu0 %v145_v63 }
  0x3d   :  { %365 = vmatpush.msrb.mxu1 %v489_v17  ;;  %326 = vmatpush.msrb.mxu0 %v151_v8 }
  0x3f   :  { %367 = vmatpush.msrb.mxu1 %v498_v20  ;;  %330 = vmatpush.msrb.mxu0 %v157_v31 }
  0x41   :  { %369 = vmatpush.msrb.mxu1 %v527_v32  ;;  %334 = vmatpush.msrb.mxu0 %v163_v36 }
  0x43   :  { %371 = vmatpush.msrb.mxu1 %v555_v44  ;;  %338 = vmatpush.msrb.mxu0 %v169_v49 }
  0x45   :  { %373 = vmatpush.msrb.mxu1 %v560_v46  ;;  %342 = vmatpush.msrb.mxu0 %v175_v56 }
  0x47   :  { %375 = vmatpush.msrb.mxu1 %v575_v52  ;;  %346 = vmatpush.msrb.mxu0 %v181_v2 }
  0x48   :  { %348 = vmatmul.f32.vlgmr.msrb.gmra.mxu0 %v637_v35 }
  0x49   :  { %377 = vmatpush.msrb.mxu1 %v580_v54 }
  0x4b   :  { %379 = vmatpush.msrb.mxu1 %v595_v60 }
  0x4d   :  { %381 = vmatpush.msrb.mxu1 %v620_v12 }
  0x4f   :  { %383 = vmatpush.msrb.mxu1 %v635_v34 }
  0x50   :  { %385 = vmatmul.f32.vlgmr.msrb.gmra.mxu1 %v637_v35 }
  0xa9   :  { %v86_v4 = vpop.f32.mrf.mxu0 }
  0xaa   :  { %v87_v5 = vadd.f32 %v86_v4, %v47_v3 }
  0xad   :  { %v187_v9 = vpop.f32.mrf.mxu1  ;;  %v280_v15 = vpop.f32.mrf.mxu3 }
  0xae   :  { %v188_v10 = vadd.f32 %v187_v9, %v87_v5 }
  0xaf   :  { %v241_v11 = vpop.f32.mrf.mxu2 }
  0xb0   :  { %v242_v14 = vadd.f32 %v241_v11, %v188_v10 }
  0xb2   :  { %v281_v16 = vadd.f32 %v280_v15, %v242_v14 }
  0xc5   :  { %v349_v17 = vpop.f32.mrf.mxu0 }
  0xc6   :  { %v350_v18 = vadd.f32 %v349_v17, %v281_v16 }
  0xcd   :  { %v386_v19 = vpop.f32.mrf.mxu1 }
  0xce   :  { %v387_v20 = vadd.f32 %v386_v19, %v350_v18 }
  0xd0   :  { %v389_v23 = vmax.f32 %v387_v20, 0.0 }
  0xd2   :  { %v391_v25 = vmul.f32 %v390_v22, %v389_v23 }
  0xd4   :  { %v393_v26 = vadd.f32 %v392_v24, %v391_v25 }
  0xd6   :  { %v394_v27 = vmax.f32 %v393_v26, 0.0 }
  0xd8   :  { %396 = vst.msk [vmem:[%s738_s3] sm:$0x1] %vm395_vm0, %v394_v27 }
  0xd9   :  { %401 = vsyncpa [#allocation3], 1 }

</bundles_post_ra>
